<compile_context>
chip_gen: v7x
topology: tpu7x:2x2x1
jax: 0.10.0
libtpu: 0.0.40
codegen_flags: <defaults>
</compile_context>

<pallas_src>
import functools

import jax
import jax.numpy as jnp
from jax import lax
from jax.experimental import pallas as pl
from jax.experimental.pallas import tpu as pltpu

LANE = 128


def _round_up(x, m):
    return (x + m - 1) // m * m


def maslf_kernel(logits_ref, soft_ref, labels_ref, out_ref,
                 acc_h, acc_s, acc_c, *,
                 inv_temperature, batch, tiles_per_core, block_cols,
                 first_masked_tile, mask_tail):
    p = pl.program_id(0)          # batch split index ("parallel": per-TC on v7x)
    j = pl.program_id(1)          # tile index within this split ("arbitrary")
    nj = pl.num_programs(1)

    @pl.when(j == 0)
    def _init():
        acc_h[...] = jnp.zeros_like(acc_h)
        acc_s[...] = jnp.zeros_like(acc_s)
        acc_c[...] = jnp.zeros_like(acc_c)

    x = logits_ref[...].astype(jnp.float32)      # (C, TB)  logits^T tile
    s = soft_ref[...].astype(jnp.float32)        # (C, TB)  soft labels^T tile
    lbl = labels_ref[...]                        # (1, TB)  int32 hard labels
    C, TB = x.shape

    # ---- softmax pieces over the class (sublane) axis ----------------------
    xmax = jnp.max(x, axis=0, keepdims=True)                # (1, TB)
    xs = x - xmax
    ex = jnp.exp(xs)
    sumexp = jnp.sum(ex, axis=0, keepdims=True)             # >= 1 always
    logsum = jnp.log(sumexp)
    r = pl.reciprocal(sumexp, approx=True)                  # EUP slot
    r = r * (2.0 - sumexp * r)                              # one Newton step
    probs = ex * r
    probs_sum = sumexp * r                                  # == sum_c probs

    # temperature log-softmax denominator: reuse xs (max(x/T) == max(x)/T)
    logsum_t = jnp.log(jnp.sum(jnp.exp(xs * inv_temperature),
                               axis=0, keepdims=True))

    # single log(soft + 1e-8): serves both the xlogy(soft) term (0*log(eps)=0,
    # same value as torch's xlogy to ~1e-8) and the log(soft+1e-8) JS operand.
    log_s = jnp.log(s + 1e-8)

    # ---- (1, TB) class reductions (no logp / logp_t materialization) -------
    s_sum = jnp.sum(s, axis=0, keepdims=True)
    s_logs = jnp.sum(s * log_s, axis=0, keepdims=True)
    s_xs = jnp.sum(s * xs, axis=0, keepdims=True)

    cls = lax.broadcasted_iota(jnp.int32, (C, TB), 0)
    picked = jnp.sum(jnp.where(cls == lbl, xs, 0.0),
                     axis=0, keepdims=True)                 # xs at the hard label

    m = 0.5 * (probs + s)
    m_sum = 0.5 * (probs_sum + s_sum)
    # xlogy-safe: m == 0 (softmax underflow + zero soft label) contributes 0.
    m_logm = jnp.sum(m * jnp.log(jnp.maximum(m, 1e-30)), axis=0, keepdims=True)
    m_xs = jnp.sum(m * xs, axis=0, keepdims=True)
    m_logs = jnp.sum(m * log_s, axis=0, keepdims=True)

    # per-column (per-sample) partial losses
    hard_col = picked - logsum                                   # logp[label]
    soft_col = s_logs - inv_temperature * s_xs + logsum_t * s_sum
    cons_col = 2.0 * m_logm - (m_xs - logsum * m_sum) - m_logs   # kl1 + kl2

    if mask_tail:
        t = p * tiles_per_core + j

        @pl.when(t < first_masked_tile)          # steady state: no mask math
        def _acc_full():
            acc_h[...] += hard_col
            acc_s[...] += soft_col
            acc_c[...] += cons_col

        @pl.when(t >= first_masked_tile)         # tiles containing padded cols
        def _acc_tail():
            col = t * block_cols + lax.broadcasted_iota(jnp.int32, (1, TB), 1)
            valid = (col < batch).astype(jnp.float32)
            acc_h[...] += hard_col * valid
            acc_s[...] += soft_col * valid
            acc_c[...] += cons_col * valid
    else:
        acc_h[...] += hard_col
        acc_s[...] += soft_col
        acc_c[...] += cons_col

    # ---- finalize: lane-reduce accumulators, write per-split partial sums ---
    @pl.when(j == nj - 1)
    def _finalize():
        h = jnp.sum(acc_h[...])
        so = jnp.sum(acc_s[...])
        co = jnp.sum(acc_c[...])
        sub = lax.broadcasted_iota(jnp.int32, (8, 128), 0)
        out_ref[0] = (jnp.where(sub == 0, h, 0.0)
                      + jnp.where(sub == 1, so, 0.0)
                      + jnp.where(sub == 2, co, 0.0))


def _auto_tile_cols(bytes_per_col, vmem_cap):
    # ~16 compiler-materialized (8, TB) f32 full-tile temporaries -> 512 B/col,
    # plus double-buffered input tiles.
    temp_bytes_per_col = 16 * 8 * 4
    budget = max(1 << 20, vmem_cap // 3)
    tb = budget // (2 * bytes_per_col + temp_bytes_per_col)
    # generation-aware cap: 128 MiB VMEM (v5e/v6e) -> 32K cols, 64 MiB (v7x) -> 16K
    cap = 32768 if vmem_cap >= (96 << 20) else 16384
    tb = (tb // LANE) * LANE
    return int(min(max(tb, LANE), cap))


@functools.partial(jax.jit, static_argnames=("temperature", "batch_tile"))
def _maslf_impl(logits, hard_labels, soft_labels, alpha, beta, *,
                temperature, batch_tile):
    B, C = logits.shape

    try:
        vmem_cap = int(pltpu.get_tpu_info().vmem_capacity_bytes)
    except Exception:
        vmem_cap = 64 * 1024 * 1024          # conservative (v7x per-core VMEM)

    in_itemsize = (jnp.dtype(logits.dtype).itemsize
                   + jnp.dtype(soft_labels.dtype).itemsize)
    bytes_per_col = C * in_itemsize + 4      # + int32 label

    if batch_tile is None:
        tb = _auto_tile_cols(bytes_per_col, vmem_cap)
    else:
        tb = int(_round_up(max(int(batch_tile), 1), LANE))
    tb = min(tb, _round_up(B, LANE))

    num_tiles = pl.cdiv(B, tb)
    num_splits = 2 if num_tiles >= 2 else 1      # 2-way parallel leading axis
    tiles_per_core = pl.cdiv(num_tiles, num_splits)
    npc = int(tiles_per_core)
    b_pad = num_splits * npc * tb
    mask_tail = b_pad != B
    first_masked_tile = B // tb

    # ---- layout plumbing (fused under jit): lane-dense [C, B] tiles ---------
    # TODO(synk): have the upstream classifier head emit [C, B] directly (or use
    # CompilerParams(allow_input_fusion=...)) to drop this transpose entirely.
    pad = b_pad - B
    logits_t = jnp.pad(logits.T, ((0, 0), (0, pad)))
    soft_t = jnp.pad(soft_labels.T, ((0, 0), (0, pad)))
    labels = jnp.pad(hard_labels.astype(jnp.int32).reshape(1, B),
                     ((0, 0), (0, pad)))

    # VMEM budget: double-buffered inputs + ~16x(8,tb) f32 temporaries +
    # accumulators + headroom, clamped below physical VMEM of this generation.
    step_bytes = tb * bytes_per_col
    temp_bytes = 16 * 8 * tb * 4
    est = 2 * step_bytes + temp_bytes + 3 * tb * 4 + (4 << 20)
    vmem_limit = int(min(max(vmem_cap - (8 << 20), 16 << 20),
                         max(32 << 20, 2 * est)))

    kernel = functools.partial(
        maslf_kernel,
        inv_temperature=1.0 / float(temperature),
        batch=int(B),
        tiles_per_core=npc,
        block_cols=int(tb),
        first_masked_tile=int(first_masked_tile),
        mask_tail=bool(mask_tail),
    )

    partials = pl.pallas_call(
        kernel,
        out_shape=jax.ShapeDtypeStruct((num_splits, 8, 128), jnp.float32),
        grid=(num_splits, npc),
        in_specs=[
            pl.BlockSpec((C, tb), lambda p, j: (0, p * npc + j)),   # logits^T
            pl.BlockSpec((C, tb), lambda p, j: (0, p * npc + j)),   # soft^T
            pl.BlockSpec((1, tb), lambda p, j: (0, p * npc + j)),   # labels
        ],
        out_specs=pl.BlockSpec((1, 8, 128), lambda p, j: (p, 0, 0)),
        scratch_shapes=[
            pltpu.VMEM((1, tb), jnp.float32),   # per-lane hard-loss partials
            pltpu.VMEM((1, tb), jnp.float32),   # per-lane soft-loss partials
            pltpu.VMEM((1, tb), jnp.float32),   # per-lane JS partials
        ],
        compiler_params=pltpu.CompilerParams(
            dimension_semantics=("parallel", "arbitrary"),
            vmem_limit_bytes=vmem_limit,
        ),
    )(logits_t, soft_t, labels)

    inv_b = 1.0 / B
    hard = -jnp.sum(partials[:, 0, 0]) * inv_b
    soft = jnp.sum(partials[:, 1, 0]) * inv_b
    cons = jnp.sum(partials[:, 2, 0]) * (0.5 * inv_b)
    total = alpha * hard + (1.0 - alpha) * soft + beta * cons
    return total, hard, soft, cons


def maslf_loss(logits, hard_labels, soft_labels,
               alpha=0.5, beta=0.1, temperature=2.0,
               epoch=None, total_epochs=None, batch_tile=None):
    """Returns (total_loss, hard_loss, soft_loss, consistency_loss) as f32 scalars."""
    if epoch is not None and total_epochs is not None:
        alpha = min(0.8, 0.2 + 0.6 * (epoch / total_epochs))
    return _maslf_impl(logits, hard_labels, soft_labels,
                       jnp.asarray(alpha, jnp.float32),
                       jnp.asarray(beta, jnp.float32),
                       temperature=float(temperature),
                       batch_tile=batch_tile)


def _maslf_loss_ref(logits, hard_labels, soft_labels,
                    alpha=0.5, beta=0.1, temperature=2.0):
    """Pure-JAX reference (mirrors the PyTorch module)."""
    b, c = logits.shape
    logits = logits.astype(jnp.float32)
    soft_labels = soft_labels.astype(jnp.float32)
    logp = jax.nn.log_softmax(logits, axis=-1)
    onehot = jax.nn.one_hot(hard_labels, c, dtype=jnp.float32)
    hard = -jnp.sum(onehot * logp) / b
    logp_t = jax.nn.log_softmax(logits / temperature, axis=-1)
    xlogy = lambda x: jnp.where(x > 0, x * jnp.log(jnp.where(x > 0, x, 1.0)), 0.0)
    soft_l = jnp.sum(xlogy(soft_labels) - soft_labels * logp_t) / b
    probs = jax.nn.softmax(logits, axis=-1)
    m = 0.5 * (probs + soft_labels)
    kl1 = jnp.sum(xlogy(m) - m * logp) / b
    kl2 = jnp.sum(xlogy(m) - m * jnp.log(soft_labels + 1e-8)) / b
    cons = 0.5 * (kl1 + kl2)
    total = alpha * hard + (1 - alpha) * soft_l + beta * cons
    return total, hard, soft_l, cons


if __name__ == "__main__":
    key = jax.random.PRNGKey(0)
    k1, k2, k3 = jax.random.split(key, 3)

    # FER-style shapes: 7 classes; batch > 128 so the tiled/masked path runs.
    batch, num_classes = 200, 7
    logits = jax.random.normal(k1, (batch, num_classes), dtype=jnp.float32)
    hard_labels = jax.random.randint(k2, (batch,), 0, num_classes, dtype=jnp.int32)
    soft_labels = jax.nn.softmax(
        jax.random.normal(k3, (batch, num_classes), dtype=jnp.float32), axis=-1)

    # two-tile path: grid (2, 1) -> 2-way parallel split + masked tail tile
    out_tiled = maslf_loss(logits, hard_labels, soft_labels,
                           alpha=0.5, beta=0.1, temperature=2.0,
                           epoch=3, total_epochs=10, batch_tile=128)
    # auto-tiled path: single grid step with a masked tail
    out_auto = maslf_loss(logits, hard_labels, soft_labels,
                          alpha=0.5, beta=0.1, temperature=2.0,
                          epoch=3, total_epochs=10)
    jax.block_until_ready(out_tiled)
    jax.block_until_ready(out_auto)

    dyn_alpha = min(0.8, 0.2 + 0.6 * (3 / 10))
    ref = _maslf_loss_ref(logits, hard_labels, soft_labels,
                          alpha=dyn_alpha, beta=0.1, temperature=2.0)
    for got in (out_tiled, out_auto):
        for g, w in zip(got, ref):
            assert jnp.allclose(g, w, rtol=2e-4, atol=2e-5), (g, w)

    print("KERNEL_OK")
</pallas_src>

<mosaic_0001>
module attributes {stable_mosaic.version = 11 : i64} {
  func.func @maslf_kernel(%arg0: i32, %arg1: i32, %arg2: memref<7x128xf32, #tpu.memory_space<vmem>>, %arg3: memref<7x128xf32, #tpu.memory_space<vmem>>, %arg4: memref<1x128xi32, #tpu.memory_space<vmem>>, %arg5: memref<1x8x128xf32, #tpu.memory_space<vmem>>, %arg6: memref<1x128xf32, #tpu.memory_space<vmem>>, %arg7: memref<1x128xf32, #tpu.memory_space<vmem>>, %arg8: memref<1x128xf32, #tpu.memory_space<vmem>>) attributes {dimension_semantics = [#tpu.dimension_semantics<parallel>, #tpu.dimension_semantics<arbitrary>], iteration_bounds = array<i64: 2, 1>, scalar_prefetch = 0 : i64, scratch_operands = 3 : i64, tpu.core_type = #tpu.core_type<tc>, window_params = [{transform_indices = @transform_0, window_bounds = array<i64: 7, 128>}, {transform_indices = @transform_1, window_bounds = array<i64: 7, 128>}, {transform_indices = @transform_2, window_bounds = array<i64: 1, 128>}, {transform_indices = @transform_3, window_bounds = array<i64: 1, 8, 128>}]} {
    %c0_i32 = arith.constant 0 : i32
    %0 = arith.cmpi eq, %arg1, %c0_i32 : i32
    %1 = arith.extui %0 : i1 to i32
    %c0_i32_0 = arith.constant 0 : i32
    %2 = arith.cmpi ne, %1, %c0_i32_0 : i32
    scf.if %2 {
      %cst_30 = arith.constant 0.000000e+00 : f32
      %87 = vector.broadcast %cst_30 : f32 to vector<1x128xf32>
      %c0_31 = arith.constant 0 : index
      %c0_32 = arith.constant 0 : index
      %88 = vector.load %arg6[%c0_31, %c0_32] : memref<1x128xf32, #tpu.memory_space<vmem>>, vector<1x128xf32>
      tpu.vector_store %arg6[%c0_31, %c0_32], %87 {strides = array<i32>} : memref<1x128xf32, #tpu.memory_space<vmem>>, vector<1x128xf32>,
      %cst_33 = arith.constant 0.000000e+00 : f32
      %89 = vector.broadcast %cst_33 : f32 to vector<1x128xf32>
      %c0_34 = arith.constant 0 : index
      %c0_35 = arith.constant 0 : index
      %90 = vector.load %arg7[%c0_34, %c0_35] : memref<1x128xf32, #tpu.memory_space<vmem>>, vector<1x128xf32>
      tpu.vector_store %arg7[%c0_34, %c0_35], %89 {strides = array<i32>} : memref<1x128xf32, #tpu.memory_space<vmem>>, vector<1x128xf32>,
      %cst_36 = arith.constant 0.000000e+00 : f32
      %91 = vector.broadcast %cst_36 : f32 to vector<1x128xf32>
      %c0_37 = arith.constant 0 : index
      %c0_38 = arith.constant 0 : index
      %92 = vector.load %arg8[%c0_37, %c0_38] : memref<1x128xf32, #tpu.memory_space<vmem>>, vector<1x128xf32>
      tpu.vector_store %arg8[%c0_37, %c0_38], %91 {strides = array<i32>} : memref<1x128xf32, #tpu.memory_space<vmem>>, vector<1x128xf32>,
    } else {
    }
    %c0 = arith.constant 0 : index
    %c0_1 = arith.constant 0 : index
    %3 = vector.load %arg2[%c0, %c0_1] : memref<7x128xf32, #tpu.memory_space<vmem>>, vector<7x128xf32>
    %c0_2 = arith.constant 0 : index
    %c0_3 = arith.constant 0 : index
    %4 = vector.load %arg3[%c0_2, %c0_3] : memref<7x128xf32, #tpu.memory_space<vmem>>, vector<7x128xf32>
    %c0_4 = arith.constant 0 : index
    %c0_5 = arith.constant 0 : index
    %5 = vector.load %arg4[%c0_4, %c0_5] : memref<1x128xi32, #tpu.memory_space<vmem>>, vector<1x128xi32>
    %cst = arith.constant dense<0xFF800000> : vector<128xf32>
    %6 = vector.multi_reduction <maximumf>, %3, %cst [0] : vector<7x128xf32> to vector<128xf32>
    %7 = vector.shape_cast %6 : vector<128xf32> to vector<1x128xf32>
    %8 = vector.broadcast %7 : vector<1x128xf32> to vector<7x128xf32>
    %9 = arith.subf %3, %8 : vector<7x128xf32>
    %10 = math.exp %9 : vector<7x128xf32>
    %cst_6 = arith.constant dense<0.000000e+00> : vector<128xf32>
    %11 = vector.multi_reduction <add>, %10, %cst_6 [0] : vector<7x128xf32> to vector<128xf32>
    %12 = vector.shape_cast %11 : vector<128xf32> to vector<1x128xf32>
    %13 = math.log %12 : vector<1x128xf32>
    %14 = tpu.reciprocal %12 {approx = true} : vector<1x128xf32> -> vector<1x128xf32>
    %15 = arith.mulf %12, %14 : vector<1x128xf32>
    %cst_7 = arith.constant 2.000000e+00 : f32
    %16 = vector.broadcast %cst_7 : f32 to vector<1x128xf32>
    %17 = arith.subf %16, %15 : vector<1x128xf32>
    %18 = arith.mulf %14, %17 : vector<1x128xf32>
    %19 = vector.broadcast %18 : vector<1x128xf32> to vector<7x128xf32>
    %20 = arith.mulf %10, %19 : vector<7x128xf32>
    %21 = arith.mulf %12, %18 : vector<1x128xf32>
    %cst_8 = arith.constant 5.000000e-01 : f32
    %22 = vector.broadcast %cst_8 : f32 to vector<7x128xf32>
    %23 = arith.mulf %9, %22 : vector<7x128xf32>
    %24 = math.exp %23 : vector<7x128xf32>
    %cst_9 = arith.constant dense<0.000000e+00> : vector<128xf32>
    %25 = vector.multi_reduction <add>, %24, %cst_9 [0] : vector<7x128xf32> to vector<128xf32>
    %26 = vector.shape_cast %25 : vector<128xf32> to vector<1x128xf32>
    %27 = math.log %26 : vector<1x128xf32>
    %cst_10 = arith.constant 9.99999993E-9 : f32
    %28 = vector.broadcast %cst_10 : f32 to vector<7x128xf32>
    %29 = arith.addf %4, %28 : vector<7x128xf32>
    %30 = math.log %29 : vector<7x128xf32>
    %cst_11 = arith.constant dense<0.000000e+00> : vector<128xf32>
    %31 = vector.multi_reduction <add>, %4, %cst_11 [0] : vector<7x128xf32> to vector<128xf32>
    %32 = vector.shape_cast %31 : vector<128xf32> to vector<1x128xf32>
    %33 = arith.mulf %4, %30 : vector<7x128xf32>
    %cst_12 = arith.constant dense<0.000000e+00> : vector<128xf32>
    %34 = vector.multi_reduction <add>, %33, %cst_12 [0] : vector<7x128xf32> to vector<128xf32>
    %35 = vector.shape_cast %34 : vector<128xf32> to vector<1x128xf32>
    %36 = arith.mulf %4, %9 : vector<7x128xf32>
    %cst_13 = arith.constant dense<0.000000e+00> : vector<128xf32>
    %37 = vector.multi_reduction <add>, %36, %cst_13 [0] : vector<7x128xf32> to vector<128xf32>
    %38 = vector.shape_cast %37 : vector<128xf32> to vector<1x128xf32>
    %39 = tpu.iota {dimensions = array<i32: 0>} : vector<7x128xi32>
    %40 = vector.broadcast %5 : vector<1x128xi32> to vector<7x128xi32>
    %41 = arith.cmpi eq, %39, %40 : vector<7x128xi32>
    %cst_14 = arith.constant 0.000000e+00 : f32
    %42 = vector.broadcast %cst_14 : f32 to vector<7x128xf32>
    %43 = arith.select %41, %9, %42 : vector<7x128xi1>, vector<7x128xf32>
    %cst_15 = arith.constant dense<0.000000e+00> : vector<128xf32>
    %44 = vector.multi_reduction <add>, %43, %cst_15 [0] : vector<7x128xf32> to vector<128xf32>
    %45 = vector.shape_cast %44 : vector<128xf32> to vector<1x128xf32>
    %46 = arith.addf %20, %4 : vector<7x128xf32>
    %cst_16 = arith.constant 5.000000e-01 : f32
    %47 = vector.broadcast %cst_16 : f32 to vector<7x128xf32>
    %48 = arith.mulf %47, %46 : vector<7x128xf32>
    %49 = arith.addf %21, %32 : vector<1x128xf32>
    %cst_17 = arith.constant 5.000000e-01 : f32
    %50 = vector.broadcast %cst_17 : f32 to vector<1x128xf32>
    %51 = arith.mulf %50, %49 : vector<1x128xf32>
    %cst_18 = arith.constant 1.000000e-30 : f32
    %52 = vector.broadcast %cst_18 : f32 to vector<7x128xf32>
    %53 = arith.maximumf %48, %52 : vector<7x128xf32>
    %54 = math.log %53 : vector<7x128xf32>
    %55 = arith.mulf %48, %54 : vector<7x128xf32>
    %cst_19 = arith.constant dense<0.000000e+00> : vector<128xf32>
    %56 = vector.multi_reduction <add>, %55, %cst_19 [0] : vector<7x128xf32> to vector<128xf32>
    %57 = vector.shape_cast %56 : vector<128xf32> to vector<1x128xf32>
    %58 = arith.mulf %48, %9 : vector<7x128xf32>
    %cst_20 = arith.constant dense<0.000000e+00> : vector<128xf32>
    %59 = vector.multi_reduction <add>, %58, %cst_20 [0] : vector<7x128xf32> to vector<128xf32>
    %60 = vector.shape_cast %59 : vector<128xf32> to vector<1x128xf32>
    %61 = arith.mulf %48, %30 : vector<7x128xf32>
    %cst_21 = arith.constant dense<0.000000e+00> : vector<128xf32>
    %62 = vector.multi_reduction <add>, %61, %cst_21 [0] : vector<7x128xf32> to vector<128xf32>
    %63 = vector.shape_cast %62 : vector<128xf32> to vector<1x128xf32>
    %64 = arith.subf %45, %13 : vector<1x128xf32>
    %cst_22 = arith.constant 5.000000e-01 : f32
    %65 = vector.broadcast %cst_22 : f32 to vector<1x128xf32>
    %66 = arith.mulf %65, %38 : vector<1x128xf32>
    %67 = arith.subf %35, %66 : vector<1x128xf32>
    %68 = arith.mulf %27, %32 : vector<1x128xf32>
    %69 = arith.addf %67, %68 : vector<1x128xf32>
    %cst_23 = arith.constant 2.000000e+00 : f32
    %70 = vector.broadcast %cst_23 : f32 to vector<1x128xf32>
    %71 = arith.mulf %70, %57 : vector<1x128xf32>
    %72 = arith.mulf %13, %51 : vector<1x128xf32>
    %73 = arith.subf %60, %72 : vector<1x128xf32>
    %74 = arith.subf %71, %73 : vector<1x128xf32>
    %75 = arith.subf %74, %63 : vector<1x128xf32>
    %c1_i32 = arith.constant 1 : i32
    %76 = arith.muli %arg0, %c1_i32 : i32
    %77 = arith.addi %76, %arg1 : i32
    %c1_i32_24 = arith.constant 1 : i32
    %78 = arith.cmpi slt, %77, %c1_i32_24 : i32
    %79 = arith.extui %78 : i1 to i32
    %c0_i32_25 = arith.constant 0 : i32
    %80 = arith.cmpi ne, %79, %c0_i32_25 : i32
    scf.if %80 {
      %c0_30 = arith.constant 0 : index
      %c0_31 = arith.constant 0 : index
      %87 = vector.load %arg6[%c0_30, %c0_31] : memref<1x128xf32, #tpu.memory_space<vmem>>, vector<1x128xf32>
      %88 = arith.addf %87, %64 : vector<1x128xf32>
      %c0_32 = arith.constant 0 : index
      %c0_33 = arith.constant 0 : index
      %89 = vector.load %arg6[%c0_32, %c0_33] : memref<1x128xf32, #tpu.memory_space<vmem>>, vector<1x128xf32>
      tpu.vector_store %arg6[%c0_32, %c0_33], %88 {strides = array<i32>} : memref<1x128xf32, #tpu.memory_space<vmem>>, vector<1x128xf32>,
      %c0_34 = arith.constant 0 : index
      %c0_35 = arith.constant 0 : index
      %90 = vector.load %arg7[%c0_34, %c0_35] : memref<1x128xf32, #tpu.memory_space<vmem>>, vector<1x128xf32>
      %91 = arith.addf %90, %69 : vector<1x128xf32>
      %c0_36 = arith.constant 0 : index
      %c0_37 = arith.constant 0 : index
      %92 = vector.load %arg7[%c0_36, %c0_37] : memref<1x128xf32, #tpu.memory_space<vmem>>, vector<1x128xf32>
      tpu.vector_store %arg7[%c0_36, %c0_37], %91 {strides = array<i32>} : memref<1x128xf32, #tpu.memory_space<vmem>>, vector<1x128xf32>,
      %c0_38 = arith.constant 0 : index
      %c0_39 = arith.constant 0 : index
      %93 = vector.load %arg8[%c0_38, %c0_39] : memref<1x128xf32, #tpu.memory_space<vmem>>, vector<1x128xf32>
      %94 = arith.addf %93, %75 : vector<1x128xf32>
      %c0_40 = arith.constant 0 : index
      %c0_41 = arith.constant 0 : index
      %95 = vector.load %arg8[%c0_40, %c0_41] : memref<1x128xf32, #tpu.memory_space<vmem>>, vector<1x128xf32>
      tpu.vector_store %arg8[%c0_40, %c0_41], %94 {strides = array<i32>} : memref<1x128xf32, #tpu.memory_space<vmem>>, vector<1x128xf32>,
    } else {
    }
    %c1_i32_26 = arith.constant 1 : i32
    %81 = arith.cmpi sge, %77, %c1_i32_26 : i32
    %82 = arith.extui %81 : i1 to i32
    %c0_i32_27 = arith.constant 0 : i32
    %83 = arith.cmpi ne, %82, %c0_i32_27 : i32
    scf.if %83 {
      %c128_i32 = arith.constant 128 : i32
      %87 = arith.muli %77, %c128_i32 : i32
      %88 = tpu.iota {dimensions = array<i32: 1>} : vector<1x128xi32>
      %89 = vector.broadcast %87 : i32 to vector<1x128xi32>
      %90 = arith.addi %89, %88 : vector<1x128xi32>
      %c200_i32 = arith.constant 200 : i32
      %91 = vector.broadcast %c200_i32 : i32 to vector<1x128xi32>
      %92 = arith.cmpi slt, %90, %91 : vector<1x128xi32>
      %93 = arith.extui %92 : vector<1x128xi1> to vector<1x128xi32>
      %94 = arith.sitofp %93 : vector<1x128xi32> to vector<1x128xf32>
      %c0_30 = arith.constant 0 : index
      %c0_31 = arith.constant 0 : index
      %95 = vector.load %arg6[%c0_30, %c0_31] : memref<1x128xf32, #tpu.memory_space<vmem>>, vector<1x128xf32>
      %96 = arith.mulf %64, %94 : vector<1x128xf32>
      %97 = arith.addf %95, %96 : vector<1x128xf32>
      %c0_32 = arith.constant 0 : index
      %c0_33 = arith.constant 0 : index
      %98 = vector.load %arg6[%c0_32, %c0_33] : memref<1x128xf32, #tpu.memory_space<vmem>>, vector<1x128xf32>
      tpu.vector_store %arg6[%c0_32, %c0_33], %97 {strides = array<i32>} : memref<1x128xf32, #tpu.memory_space<vmem>>, vector<1x128xf32>,
      %c0_34 = arith.constant 0 : index
      %c0_35 = arith.constant 0 : index
      %99 = vector.load %arg7[%c0_34, %c0_35] : memref<1x128xf32, #tpu.memory_space<vmem>>, vector<1x128xf32>
      %100 = arith.mulf %69, %94 : vector<1x128xf32>
      %101 = arith.addf %99, %100 : vector<1x128xf32>
      %c0_36 = arith.constant 0 : index
      %c0_37 = arith.constant 0 : index
      %102 = vector.load %arg7[%c0_36, %c0_37] : memref<1x128xf32, #tpu.memory_space<vmem>>, vector<1x128xf32>
      tpu.vector_store %arg7[%c0_36, %c0_37], %101 {strides = array<i32>} : memref<1x128xf32, #tpu.memory_space<vmem>>, vector<1x128xf32>,
      %c0_38 = arith.constant 0 : index
      %c0_39 = arith.constant 0 : index
      %103 = vector.load %arg8[%c0_38, %c0_39] : memref<1x128xf32, #tpu.memory_space<vmem>>, vector<1x128xf32>
      %104 = arith.mulf %75, %94 : vector<1x128xf32>
      %105 = arith.addf %103, %104 : vector<1x128xf32>
      %c0_40 = arith.constant 0 : index
      %c0_41 = arith.constant 0 : index
      %106 = vector.load %arg8[%c0_40, %c0_41] : memref<1x128xf32, #tpu.memory_space<vmem>>, vector<1x128xf32>
      tpu.vector_store %arg8[%c0_40, %c0_41], %105 {strides = array<i32>} : memref<1x128xf32, #tpu.memory_space<vmem>>, vector<1x128xf32>,
    } else {
    }
    %c0_i32_28 = arith.constant 0 : i32
    %84 = arith.cmpi eq, %arg1, %c0_i32_28 : i32
    %85 = arith.extui %84 : i1 to i32
    %c0_i32_29 = arith.constant 0 : i32
    %86 = arith.cmpi ne, %85, %c0_i32_29 : i32
    scf.if %86 {
      %c0_30 = arith.constant 0 : index
      %c0_31 = arith.constant 0 : index
      %87 = vector.load %arg6[%c0_30, %c0_31] : memref<1x128xf32, #tpu.memory_space<vmem>>, vector<1x128xf32>
      %88 = vector.shape_cast %87 : vector<1x128xf32> to vector<1x1x128xf32>
      %cst_32 = arith.constant dense<0.000000e+00> : vector<1xf32>
      %89 = vector.multi_reduction <add>, %88, %cst_32 [1, 2] : vector<1x1x128xf32> to vector<1xf32>
      %90 = vector.shape_cast %89 : vector<1xf32> to vector<1x1x1xf32>
      %91 = vector.extract %90[0, 0, 0] : f32 from vector<1x1x1xf32>
      %c0_33 = arith.constant 0 : index
      %c0_34 = arith.constant 0 : index
      %92 = vector.load %arg7[%c0_33, %c0_34] : memref<1x128xf32, #tpu.memory_space<vmem>>, vector<1x128xf32>
      %93 = vector.shape_cast %92 : vector<1x128xf32> to vector<1x1x128xf32>
      %cst_35 = arith.constant dense<0.000000e+00> : vector<1xf32>
      %94 = vector.multi_reduction <add>, %93, %cst_35 [1, 2] : vector<1x1x128xf32> to vector<1xf32>
      %95 = vector.shape_cast %94 : vector<1xf32> to vector<1x1x1xf32>
      %96 = vector.extract %95[0, 0, 0] : f32 from vector<1x1x1xf32>
      %c0_36 = arith.constant 0 : index
      %c0_37 = arith.constant 0 : index
      %97 = vector.load %arg8[%c0_36, %c0_37] : memref<1x128xf32, #tpu.memory_space<vmem>>, vector<1x128xf32>
      %98 = vector.shape_cast %97 : vector<1x128xf32> to vector<1x1x128xf32>
      %cst_38 = arith.constant dense<0.000000e+00> : vector<1xf32>
      %99 = vector.multi_reduction <add>, %98, %cst_38 [1, 2] : vector<1x1x128xf32> to vector<1xf32>
      %100 = vector.shape_cast %99 : vector<1xf32> to vector<1x1x1xf32>
      %101 = vector.extract %100[0, 0, 0] : f32 from vector<1x1x1xf32>
      %102 = tpu.iota {dimensions = array<i32: 0>} : vector<8x128xi32>
      %c0_i32_39 = arith.constant 0 : i32
      %103 = vector.broadcast %c0_i32_39 : i32 to vector<8x128xi32>
      %104 = arith.cmpi eq, %102, %103 : vector<8x128xi32>
      %cst_40 = arith.constant 0.000000e+00 : f32
      %105 = vector.broadcast %91 : f32 to vector<8x128xf32>
      %106 = vector.broadcast %cst_40 : f32 to vector<8x128xf32>
      %107 = arith.select %104, %105, %106 : vector<8x128xi1>, vector<8x128xf32>
      %c1_i32_41 = arith.constant 1 : i32
      %108 = vector.broadcast %c1_i32_41 : i32 to vector<8x128xi32>
      %109 = arith.cmpi eq, %102, %108 : vector<8x128xi32>
      %cst_42 = arith.constant 0.000000e+00 : f32
      %110 = vector.broadcast %96 : f32 to vector<8x128xf32>
      %111 = vector.broadcast %cst_42 : f32 to vector<8x128xf32>
      %112 = arith.select %109, %110, %111 : vector<8x128xi1>, vector<8x128xf32>
      %113 = arith.addf %107, %112 : vector<8x128xf32>
      %c2_i32 = arith.constant 2 : i32
      %114 = vector.broadcast %c2_i32 : i32 to vector<8x128xi32>
      %115 = arith.cmpi eq, %102, %114 : vector<8x128xi32>
      %cst_43 = arith.constant 0.000000e+00 : f32
      %116 = vector.broadcast %101 : f32 to vector<8x128xf32>
      %117 = vector.broadcast %cst_43 : f32 to vector<8x128xf32>
      %118 = arith.select %115, %116, %117 : vector<8x128xi1>, vector<8x128xf32>
      %119 = arith.addf %113, %118 : vector<8x128xf32>
      %c0_44 = arith.constant 0 : index
      %c0_45 = arith.constant 0 : index
      %c0_46 = arith.constant 0 : index
      %120 = vector.load %arg5[%c0_44, %c0_45, %c0_46] : memref<1x8x128xf32, #tpu.memory_space<vmem>>, vector<1x8x128xf32>
      %121 = vector.shape_cast %120 : vector<1x8x128xf32> to vector<8x128xf32>
      %122 = vector.shape_cast %119 : vector<8x128xf32> to vector<1x8x128xf32>
      tpu.vector_store %arg5[%c0_44, %c0_45, %c0_46], %122 {strides = array<i32>} : memref<1x8x128xf32, #tpu.memory_space<vmem>>, vector<1x8x128xf32>,
    } else {
    }
    return
  }
  func.func @transform_0(%arg0: i32, %arg1: i32) -> (i32, i32) {
    %c1_i32 = arith.constant 1 : i32
    %0 = arith.muli %arg0, %c1_i32 : i32
    %1 = arith.addi %0, %arg1 : i32
    %c0_i32 = arith.constant 0 : i32
    %c0_i32_0 = arith.constant 0 : i32
    return %c0_i32, %1 : i32, i32
  }
  func.func @transform_1(%arg0: i32, %arg1: i32) -> (i32, i32) {
    %c1_i32 = arith.constant 1 : i32
    %0 = arith.muli %arg0, %c1_i32 : i32
    %1 = arith.addi %0, %arg1 : i32
    %c0_i32 = arith.constant 0 : i32
    %c0_i32_0 = arith.constant 0 : i32
    return %c0_i32, %1 : i32, i32
  }
  func.func @transform_2(%arg0: i32, %arg1: i32) -> (i32, i32) {
    %c1_i32 = arith.constant 1 : i32
    %0 = arith.muli %arg0, %c1_i32 : i32
    %1 = arith.addi %0, %arg1 : i32
    %c0_i32 = arith.constant 0 : i32
    %c0_i32_0 = arith.constant 0 : i32
    return %c0_i32, %1 : i32, i32
  }
  func.func @transform_3(%arg0: i32, %arg1: i32) -> (i32, i32, i32) {
    %c0_i32 = arith.constant 0 : i32
    %c0_i32_0 = arith.constant 0 : i32
    %c0_i32_1 = arith.constant 0 : i32
    return %arg0, %c0_i32, %c0_i32_0 : i32, i32, i32
  }
}

</mosaic_0001>

<bundles_post_ra>
// kernel: _maslf_impl.1
= control target key start
LH: loop header
LB: loop body
LE: loop exit
PB: predicated region body
PF: predicated region fallthrough
CT: control target
= control target key end

     0   :  { %s636_s12 = smov 0   ;;  %s638_s13 = smov 0   ;;  %s739_s0 = inlined_call_operand.vmem [shape: f32[7,256], index: 0, kind: input, shape index: {}]   ;;  %s740_s1 = inlined_call_operand.vmem [shape: f32[7,256], index: 1, kind: input, shape index: {}]   ;;  %s741_s2 = inlined_call_operand.vmem [shape: s32[1,256], index: 2, kind: input, shape index: {}]   ;;  %s742_s3 = inlined_call_operand.vmem [shape: f32[2,8,128], index: 3, kind: output, shape index: {}]  }
   0x1   :  { %s640_s14 = smov 0  }
   0x2 LB: > { %s25_s15 = sadd.s32 1, %s608_s13  ;;  %p533_p0 = scmp.ge.s32.totalorder %s612_s14, 1  ;;  %s612_s14 = sphi %s640_s14, %s13_s14   ;;  %s608_s13 = sphi %s638_s13, %s744_s13   ;;  %s604_s12 = sphi %s636_s12, %s743_s12  }
   0x3   : > { %p27_p1 = scmp.ge.s32.totalorder %s25_s15, 2  ;;  %p177_p2 = scmp.lt.s32.totalorder %s612_s14, 3 }
   0x5   : > { %s746_s15 = smov (%p27_p1, %s25_s15), 0  ;;  %p178_p3 = pnand %p533_p0, %p177_p2 }
   0x6   : > { %p210_p4 = scmp.lt.s32.totalorder (!%p178_p3), %s604_s12, 1  ;;  %v614_v0 = vmov (!%p178_p3), 0.0   ;;  %vm240_vm0 = vcmask (!%p178_p3), 1046528   ;;  %v304_v8 = vlaneseq (!%p178_p3)  ;;  %p538_p5 = scmp.ge.s32.totalorder (!%p178_p3), %s604_s12, 1 }
   0x7   : > { %181 = sbr.rel (%p178_p3) target bundleno = 357 (0x165), region = 32  ;;  %234 = vst [vmem:[#allocation2] sm:$0x1] (!%p178_p3), %v614_v0  ;;  %235 = vst [vmem:[#allocation3] sm:$0x1] (!%p178_p3), %v614_v0 }
   0x8   : > { %236 = vst [vmem:[#allocation4] sm:$0x1] (!%p178_p3), %v614_v0  ;;  %v682_v11 = vshrl.u32 (!%p178_p3), %v304_v8, 7 }
   0xe   : > { %s211_s16 = scalar_select %p210_p4, %s604_s12, 1 }
  0x10   : > { %s660_s17 = sshll.u32 %s211_s16, 3  ;;  %s224_s29 = scalar_lea.vmem %s741_s2, %s211_s16 }
  0x11   : > { %s213_s20 = scalar_lea.vmem %s739_s0, %s660_s17  ;;  %s219_s23 = scalar_lea.vmem %s740_s1, %s660_s17  ;;  %v537_v12 = vld [vmem:[%s224_s29] ss:$0 sm:$0xff] }
  0x12   : > { %s229_s26 = scalar_lea.vmem %s742_s3, %s660_s17  ;;  %v237_v1 = vld [vmem:[%s213_s20] sm:$0x7f]  ;;  %vm310_vm1 = vcmp.eq.s32.totalorder %v682_v11, %v537_v12 }
  0x13   : > { %v241_v2 = vsel %vm240_vm0, %v237_v1, -inf  ;;  %v675_v3 = vld [vmem:[%s219_s23] sm:$0x7f] }
  0x14   : > { %v242_v4 = vrot.slane %v241_v2, 4  ;;  %v278_v5 = vadd.f32 1e-08, %v675_v3  ;;  %v281_v31 = vsel %vm240_vm0, %v675_v3, 0.0 }
  0x15   : > { %v282_v40 = vrot.slane %v281_v31, 4 }
  0x16   : > { %v243_v6 = vmax.f32 %v241_v2, %v242_v4  ;;  %576 = vlog2.f32 %v278_v5 }
  0x17   : > { %v283_v48 = vadd.f32 %v282_v40, %v281_v31 }
  0x18   : > { %v244_v7 = vrot.slane %v243_v6, 2 }
  0x19   : > { %v284_v55 = vrot.slane %v283_v48, 2 }
  0x1a   : > { %v245_v9 = vmax.f32 %v243_v6, %v244_v7 }
  0x1b   : > { %v285_v59 = vadd.f32 %v284_v55, %v283_v48 }
  0x1c   : > { %v246_v10 = vrot.slane %v245_v9, 1 }
  0x1d   : > { %v286_v63 = vrot.slane %v285_v59, 1 }
  0x1e   : > { %v247_v13 = vmax.f32 %v245_v9, %v246_v10 }
  0x1f   : > { %v287_v12 = vadd.f32 %v286_v63, %v285_v59 }
  0x20   : > { %v684_v14 = vsub.f32 %v237_v1, %v247_v13  ;;  %v577_v17 = vpop.eup %576 }
  0x21   : > { %v690_v20 = vmul.f32 0.6931472, %v577_v17 }
  0x22   : > { %v249_v15 = vmul.f32 1.442695, %v684_v14  ;;  %v266_v16 = vmul.f32 0.5, %v684_v14  ;;  %v311_v18 = vsel %vm310_vm1, %v684_v14, 0.0  ;;  %v296_v21 = vmul.f32 %v684_v14, %v675_v3 }
  0x23   : > { %v288_v22 = vmul.f32 %v690_v20, %v675_v3  ;;  %v312_v27 = vsel %vm240_vm0, %v311_v18, 0.0 }
  0x24   : > { %578 = vpow2.f32 %v249_v15  ;;  %v267_v19 = vmul.f32 1.442695, %v266_v16  ;;  %v297_v23 = vsel %vm240_vm0, %v296_v21, 0.0  ;;  %v313_v35 = vrot.slane %v312_v27, 4 }
  0x25   : > { %v298_v24 = vrot.slane %v297_v23, 4  ;;  %v289_v26 = vsel %vm240_vm0, %v288_v22, 0.0 }
  0x26   : > { %580 = vpow2.f32 %v267_v19  ;;  %v290_v33 = vrot.slane %v289_v26, 4  ;;  %v314_v43 = vadd.f32 %v313_v35, %v312_v27 }
  0x27   : > { %v299_v34 = vadd.f32 %v298_v24, %v297_v23 }
  0x28   : > { %v291_v41 = vadd.f32 %v290_v33, %v289_v26  ;;  %v315_v51 = vrot.slane %v314_v43, 2 }
  0x29   : > { %v300_v42 = vrot.slane %v299_v34, 2 }
  0x2a   : > { %v292_v49 = vrot.slane %v291_v41, 2  ;;  %v316_v58 = vadd.f32 %v315_v51, %v314_v43 }
  0x2b   : > { %v301_v50 = vadd.f32 %v300_v42, %v299_v34 }
  0x2c   : > { %v293_v56 = vadd.f32 %v292_v49, %v291_v41  ;;  %v317_v62 = vrot.slane %v316_v58, 1 }
  0x2d   : > { %v302_v57 = vrot.slane %v301_v50, 1 }
  0x2e   : > { %v579_v25 = vpop.eup %578  ;;  %v294_v60 = vrot.slane %v293_v56, 1  ;;  %v318_v1 = vadd.f32 %v317_v62, %v316_v58  ;;  %v371_v58 = vld [vmem:[#allocation4] sm:$0x1] (!%p538_p5) }
  0x2f   : > { %v251_v28 = vsel %vm240_vm0, %v579_v25, 0.0  ;;  %v303_v61 = vadd.f32 %v302_v57, %v301_v50  ;;  %v368_v57 = vld [vmem:[#allocation3] sm:$0x1] (!%p538_p5) }
  0x30   : > { %v581_v29 = vpop.eup %580  ;;  %v252_v30 = vrot.slane %v251_v28, 4  ;;  %v295_v0 = vadd.f32 %v294_v60, %v293_v56  ;;  %v365_v56 = vld [vmem:[#allocation2] sm:$0x1] (!%p538_p5) }
  0x31   : > { %v269_v32 = vsel %vm240_vm0, %v581_v29, 0.0  ;;  %v351_v2 = vmul.f32 0.5, %v303_v61 }
  0x32   : > { %v253_v36 = vadd.f32 %v252_v30, %v251_v28  ;;  %v270_v37 = vrot.slane %v269_v32, 4 }
  0x33   : > { %v352_v15 = vsub.f32 %v295_v0, %v351_v2 }
  0x34   : > { %v254_v38 = vrot.slane %v253_v36, 2  ;;  %v271_v39 = vadd.f32 %v270_v37, %v269_v32 }
  0x36   : > { %v255_v44 = vadd.f32 %v254_v38, %v253_v36  ;;  %v272_v45 = vrot.slane %v271_v39, 2 }
  0x38   : > { %v256_v46 = vrot.slane %v255_v44, 1  ;;  %v273_v47 = vadd.f32 %v272_v45, %v271_v39 }
  0x3a   : > { %v257_v52 = vadd.f32 %v256_v46, %v255_v44  ;;  %v274_v53 = vrot.slane %v273_v47, 1 }
  0x3c   : > { %582 = vlog2.f32 %v257_v52  ;;  %v275_v54 = vadd.f32 %v274_v53, %v273_v47 }
  0x3d   : > { %584 = vrcp.f32 %v257_v52 }
  0x3e   : > { %586 = vlog2.f32 %v275_v54 }
  0x46   : > { %v583_v4 = vpop.eup %582 }
  0x47   : > { %v585_v5 = vpop.eup %584  ;;  %v259_v6 = vmul.f32 0.6931472, %v583_v4 }
  0x48   : > { %v587_v7 = vpop.eup %586  ;;  %v261_v9 = vmul.f32 %v585_v5, %v257_v52 }
  0x49   : > { %v277_v10 = vmul.f32 0.6931472, %v587_v7  ;;  %v703_v13 = vsub.f32 %v318_v1, %v259_v6 }
  0x4a   : > { %v262_v16 = vsub.f32 2.0, %v261_v9 }
  0x4b   : > { %v353_v17 = vmul.f32 %v287_v12, %v277_v10  ;;  %v366_v59 = vadd.f32 (!%p538_p5), %v365_v56, %v703_v13 }
  0x4c   : > { %v263_v18 = vmul.f32 %v585_v5, %v262_v16 }
  0x4d   : > { %v705_v19 = vadd.f32 %v353_v17, %v352_v15  ;;  %367 = vst [vmem:[#allocation2] sm:$0x1] (!%p538_p5), %v366_v59 }
  0x4e   : > { %v264_v21 = vmul.f32 %v579_v25, %v263_v18  ;;  %v265_v34 = vmul.f32 %v263_v18, %v257_v52 }
  0x4f   : > { %v369_v60 = vadd.f32 (!%p538_p5), %v368_v57, %v705_v19 }
  0x50   : > { %v319_v22 = vadd.f32 %v264_v21, %v675_v3  ;;  %v321_v37 = vadd.f32 %v287_v12, %v265_v34 }
  0x51   : > { %370 = vst [vmem:[#allocation3] sm:$0x1] (!%p538_p5), %v369_v60 }
  0x52   : > { %v320_v23 = vmul.f32 0.5, %v319_v22  ;;  %v322_v41 = vmul.f32 0.5, %v321_v37 }
  0x54   : > { %v323_v24 = vmax.f32 %v320_v23, 1e-30  ;;  %v334_v26 = vmul.f32 %v320_v23, %v684_v14  ;;  %v342_v28 = vmul.f32 %v320_v23, %v690_v20  ;;  %v356_v47 = vmul.f32 %v322_v41, %v259_v6 }
  0x56   : > { %588 = vlog2.f32 %v323_v24  ;;  %v335_v27 = vsel %vm240_vm0, %v334_v26, 0.0  ;;  %v343_v30 = vsel %vm240_vm0, %v342_v28, 0.0 }
  0x57   : > { %v336_v29 = vrot.slane %v335_v27, 4  ;;  %v344_v32 = vrot.slane %v343_v30, 4 }
  0x59   : > { %v337_v31 = vadd.f32 %v336_v29, %v335_v27  ;;  %v345_v36 = vadd.f32 %v344_v32, %v343_v30 }
  0x5b   : > { %v338_v35 = vrot.slane %v337_v31, 2  ;;  %v346_v40 = vrot.slane %v345_v36, 2 }
  0x5d   : > { %v339_v38 = vadd.f32 %v338_v35, %v337_v31  ;;  %v347_v44 = vadd.f32 %v346_v40, %v345_v36 }
  0x5f   : > { %v340_v20 = vrot.slane %v339_v38, 1  ;;  %v348_v49 = vrot.slane %v347_v44, 1 }
  0x60   : > { %v589_v33 = vpop.eup %588 }
  0x61   : > { %v325_v25 = vmul.f32 0.6931472, %v589_v33  ;;  %v341_v46 = vadd.f32 %v340_v20, %v339_v38  ;;  %v349_v52 = vadd.f32 %v348_v49, %v347_v44 }
  0x63   : > { %v326_v3 = vmul.f32 %v325_v25, %v320_v23  ;;  %v357_v51 = vsub.f32 %v341_v46, %v356_v47 }
  0x65   : > { %v327_v14 = vsel %vm240_vm0, %v326_v3, 0.0 }
  0x66   : > { %v328_v39 = vrot.slane %v327_v14, 4 }
  0x68   : > { %v329_v42 = vadd.f32 %v328_v39, %v327_v14 }
  0x6a   : > { %v330_v43 = vrot.slane %v329_v42, 2 }
  0x6c   : > { %v331_v45 = vadd.f32 %v330_v43, %v329_v42 }
  0x6e   : > { %v332_v48 = vrot.slane %v331_v45, 1 }
  0x70   : > { %v333_v50 = vadd.f32 %v332_v48, %v331_v45  ;;  %364 = sbr.rel (%p538_p5) target bundleno = 123 (0x7b), region = 40 }
  0x72   : > { %v355_v53 = vmul.f32 2.0, %v333_v50 }
  0x74   : > { %v358_v54 = vsub.f32 %v355_v53, %v357_v51 }
  0x76   : > { %v359_v55 = vsub.f32 %v358_v54, %v349_v52 }
  0x78   : > { %v372_v61 = vadd.f32 %v371_v58, %v359_v55 }
  0x7a   : > { %373 = vst [vmem:[#allocation4] sm:$0x1] %v372_v61 }
  0x7b PF: > { %377 = sbr.rel (%p210_p4) target bundleno = 135 (0x87), region = 44  ;;  %s540_s30 = sshll.u32 (!%p210_p4), %s604_s12, 7  ;;  %v380_v62 = vand.u32 (!%p210_p4), 127, %v304_v8  ;;  %v386_v1 = vld [vmem:[#allocation2] sm:$0x1] (!%p210_p4)  ;;  %v615_v2 = vmov (!%p210_p4), 0.0  }
  0x7c   : > { %v381_v63 = vstv (!%p210_p4), %s540_s30  ;;  %v390_v5 = vld [vmem:[#allocation3] sm:$0x1] (!%p210_p4) }
  0x7d   : > { %v382_v0 = vadd.s32 (!%p210_p4), %v381_v63, %v380_v62 }
  0x7f   : > { %vm383_vm2 = vcmp.lt.s32.totalorder (!%p210_p4), %v382_v0, 200 }
  0x80   : > { %v541_v4 = vsel (!%p210_p4), %vm383_vm2, 1.0, %v615_v2 }
  0x81   : > { %v394_v6 = vld [vmem:[#allocation4] sm:$0x1] (!%p210_p4)  ;;  %v387_v7 = vmul.f32 (!%p210_p4), %v541_v4, %v703_v13  ;;  %v391_v9 = vmul.f32 (!%p210_p4), %v541_v4, %v705_v19  ;;  %v395_v10 = vmul.f32 (!%p210_p4), %v541_v4, %v359_v55 }
  0x83   : > { %v388_v12 = vadd.f32 %v387_v7, %v386_v1  ;;  %v392_v15 = vadd.f32 %v391_v9, %v390_v5  ;;  %v396_v16 = vadd.f32 %v395_v10, %v394_v6 }
  0x85   : > { %389 = vst [vmem:[#allocation2] sm:$0x1] %v388_v12  ;;  %393 = vst [vmem:[#allocation3] sm:$0x1] %v392_v15 }
  0x86   : > { %397 = vst [vmem:[#allocation4] sm:$0x1] %v396_v16 }
  0x87 PF: > { %vm402_vm3 = vcmask 1040384   ;;  %vm435_vm4 = vcmp.eq.s32.totalorder %v682_v11, 0  ;;  %vm438_vm5 = vcmp.eq.s32.totalorder %v682_v11, 1  ;;  %vm442_vm6 = vcmp.eq.s32.totalorder %v682_v11, 2 }
  0x8c   : > { %v401_v17 = vld [vmem:[#allocation2] sm:$0x1]  ;;  %v413_v22 = vld [vmem:[#allocation3] sm:$0x1] }
  0x8d   : > { %v424_v8 = vld [vmem:[#allocation4] sm:$0x1]  ;;  %v403_v21 = vsel %vm402_vm3, %v401_v17, 0.0  ;;  %v414_v23 = vsel %vm402_vm3, %v413_v22, 0.0 }
  0x8e   : > { %v425_v18 = vsel %vm402_vm3, %v424_v8, 0.0  ;;  %404 = vadd.xlane.f32.xlu0 %v403_v21 }
  0x8f   : > { %426 = vadd.xlane.f32.xlu1 %v425_v18 }
  0x92   : > { %415 = vadd.xlane.f32.xlu0 %v414_v23 }
 0x11b   : > { %v405_v19 = vpop.xlane.xlu0 %404 }
 0x11c   : > { %v427_v13 = vpop.xlane.xlu1 %426  ;;  %v406_v26 = vrot.slane %v405_v19, 4 }
 0x11d   : > { %v428_v24 = vrot.slane %v427_v13, 4 }
 0x11e   : > { %v407_v28 = vadd.f32 %v406_v26, %v405_v19 }
 0x11f   : > { %v429_v27 = vadd.f32 %v428_v24, %v427_v13  ;;  %v416_v29 = vpop.xlane.xlu0 %415 }
 0x120   : > { %v408_v31 = vrot.slane %v407_v28, 2  ;;  %v417_v32 = vrot.slane %v416_v29, 4 }
 0x121   : > { %v430_v30 = vrot.slane %v429_v27, 2 }
 0x122   : > { %v418_v33 = vadd.f32 %v417_v32, %v416_v29  ;;  %v409_v34 = vadd.f32 %v408_v31, %v407_v28 }
 0x123   : > { %v431_v35 = vadd.f32 %v430_v30, %v429_v27 }
 0x124   : > { %v419_v25 = vrot.slane %v418_v33, 2  ;;  %v410_v36 = vrot.slane %v409_v34, 1 }
 0x125   : > { %v432_v38 = vrot.slane %v431_v35, 1 }
 0x126   : > { %v420_v3 = vadd.f32 %v419_v25, %v418_v33  ;;  %v411_v37 = vadd.f32 %v410_v36, %v409_v34 }
 0x127   : > { %v433_v40 = vadd.f32 %v432_v38, %v431_v35 }
 0x128   : > { %544 = vpush %v411_v37  ;;  %v421_v14 = vrot.slane %v420_v3, 1 }
 0x12a   : > { %v422_v39 = vadd.f32 %v421_v14, %v420_v3 }
 0x12c   : > { %546 = vpush %v422_v39 }
 0x12d   : > { %548 = vpush %v433_v40 }
 0x159   : > { %s545_s4 = spop %544 }
 0x15a   : > { %v436_v41 = vstv %s545_s4 }
 0x15b   : > { %v437_v20 = vsel %vm435_vm4, %v436_v41, 0.0 }
 0x15d   : > { %s547_s5 = spop %546 }
 0x15e   : > { %v439_v42 = vstv %s547_s5  ;;  %s549_s6 = spop %548 }
 0x15f   : > { %v440_v43 = vsel %vm438_vm5, %v439_v42, 0.0  ;;  %v443_v44 = vstv %s549_s6 }
 0x160   : > { %v441_v45 = vadd.f32 %v440_v43, %v437_v20  ;;  %v444_v46 = vsel %vm442_vm6, %v443_v44, 0.0 }
 0x162   : > { %v445_v47 = vadd.f32 %v444_v46, %v441_v45 }
 0x164   : > { %446 = vst [vmem:[%s229_s26] sm:$0xff] %v445_v47 }
 0x165 PF: > { %s13_s14 = sadd.s32 1, %s612_s14   ;;  %s743_s12 = smov %s608_s13 }
 0x166   : > { %p10_p6 = scmp.ge.s32.totalorder %s13_s14, 4   ;;  %s744_s13 = smov %s746_s15 }
 0x168   :  { %12 = sbr.rel (!%p10_p6) target bundleno = 2 (0x2), region = 84 }

</bundles_post_ra>
